<compile_context>
chip_gen: v5e
topology: v5e:2x2
jax: 0.10.0
libtpu: 0.0.40
codegen_flags: <defaults>
</compile_context>

<pallas_src>
import functools

import jax
import jax.numpy as jnp
from jax.experimental import pallas as pl
from jax.experimental.pallas import tpu as pltpu


def _round_up(x, m):
    return ((x + m - 1) // m) * m


def _patch_embed_kernel(x_ref, w_ref, b_ref, o_ref):
    # x_ref: (tm, K) f32   w_ref: (K, N_pad) bf16
    # b_ref: (1, N_pad) f32   o_ref: (tm, N_pad) f32
    x = x_ref[...].astype(jnp.bfloat16)   # in-kernel cast: no extra HBM pass
    acc = jnp.dot(x, w_ref[...], preferred_element_type=jnp.float32)
    o_ref[...] = (acc + b_ref[...]).astype(o_ref.dtype)


def patch_embed_matmul(x_patches, w_flat, bias, *, max_tm=512,
                       out_dtype=jnp.float32):
    """x_patches: (M, K) f32; w_flat: (K, E) f32; bias: (E,) f32 -> (M, E)."""
    M, K = x_patches.shape
    K2, E = w_flat.shape
    assert K == K2

    # Lane-dense padding only where it matters: the output / weight N dim.
    N_pad = _round_up(E, 128)

    # M tiling: choose the number of tiles first, then size tiles to minimize
    # pad rows while keeping every tile full (no ragged tiles).
    num_tiles = max(1, pl.cdiv(M, max_tm))
    tm = max(8, _round_up(pl.cdiv(M, num_tiles), 8))
    M_pad = num_tiles * tm
    grid = (num_tiles,)

    xp = x_patches
    if M_pad != M:
        xp = jnp.pad(xp, ((0, M_pad - M), (0, 0)))

    # Weight / bias are parameter-sized (tiny); cast / pad them outside.
    wp = w_flat.astype(jnp.bfloat16)
    bp = bias.reshape(1, E).astype(jnp.float32)
    if N_pad != E:
        wp = jnp.pad(wp, ((0, 0), (0, N_pad - E)))
        bp = jnp.pad(bp, ((0, 0), (0, N_pad - E)))

    # VMEM budget: double-buffered x / out tiles, resident weight + bias
    # (still allocated double-buffered by default).
    vmem_bytes = (2 * tm * K * 4          # x tiles (f32)
                  + 2 * K * N_pad * 2     # weight (bf16)
                  + 2 * N_pad * 4         # bias (f32)
                  + 2 * tm * N_pad * 4)   # out tiles (f32)
    vmem_limit = int(min(64 * 1024 * 1024,
                         max(16 * 1024 * 1024, vmem_bytes * 2)))

    out = pl.pallas_call(
        _patch_embed_kernel,
        out_shape=jax.ShapeDtypeStruct((M_pad, N_pad), jnp.float32),
        grid_spec=pltpu.PrefetchScalarGridSpec(
            num_scalar_prefetch=0,
            grid=grid,
            in_specs=[
                pl.BlockSpec((tm, K), lambda i: (i, 0)),         # patch rows
                pl.BlockSpec((K, N_pad), lambda i: (0, 0)),      # weight
                pl.BlockSpec((1, N_pad), lambda i: (0, 0)),      # bias
            ],
            out_specs=pl.BlockSpec((tm, N_pad), lambda i: (i, 0)),
        ),
        compiler_params=pltpu.CompilerParams(
            dimension_semantics=("parallel",),
            vmem_limit_bytes=vmem_limit,
        ),
    )(xp, wp, bp)

    # Strip the M / N padding.
    return out[:M, :E].astype(out_dtype)


def patch_encoder_forward(x_nchw, conv_w, conv_b, *, patch_size):
    """x_nchw: (B, C, H, W); conv_w: (E, C, P, P); conv_b: (E,)."""
    B, C, H, W = x_nchw.shape
    E = conv_w.shape[0]
    P = patch_size
    Hp, Wp = H // P, W // P
    num_patches = Hp * Wp

    # Rearrange input into patch matrix: (B*num_patches, C*P*P) in (c, i, j)
    # order so it matches Conv2d weight flattening.  (Layout-only XLA op.)
    xp = x_nchw.reshape(B, C, Hp, P, Wp, P)
    xp = jnp.transpose(xp, (0, 2, 4, 1, 3, 5))            # (B, Hp, Wp, C, P, P)
    xp = xp.reshape(B * num_patches, C * P * P)

    # Conv weight -> dense projection matrix (C*P*P, E).
    w_flat = conv_w.reshape(E, C * P * P).T

    out = patch_embed_matmul(xp, w_flat, conv_b)           # (B*num_patches, E)
    return out.reshape(B, num_patches, E)


if __name__ == "__main__":
    # Small shapes consistent with the module's forward:
    # img_size=16, patch_size=4, channels=3, embedd_dim=32, batch=2
    B, C, H, W = 2, 3, 16, 16
    P = 4
    E = 32

    key = jax.random.PRNGKey(0)
    kx, kw, kb = jax.random.split(key, 3)
    x = jax.random.normal(kx, (B, C, H, W), dtype=jnp.float32)
    # Deterministic synthetic Conv2d parameters (shapes from nn.Conv2d(C, E, P, P)).
    conv_w = jax.random.normal(kw, (E, C, P, P), dtype=jnp.float32) * 0.02
    conv_b = jax.random.normal(kb, (E,), dtype=jnp.float32) * 0.01

    fwd = jax.jit(functools.partial(patch_encoder_forward, patch_size=P))
    out = fwd(x, conv_w, conv_b)
    jax.block_until_ready(out)

    # Sanity check against a pure-JAX f32 reference (strided conv == patch
    # matmul).  Tolerance accounts for bf16 rounding of the MXU operands
    # (accumulation is f32).
    ref = jax.lax.conv_general_dilated(
        x, conv_w, window_strides=(P, P), padding="VALID",
        dimension_numbers=("NCHW", "OIHW", "NCHW"))
    ref = ref + conv_b.reshape(1, E, 1, 1)
    ref = ref.reshape(B, E, -1).transpose(0, 2, 1)         # (B, num_patches, E)
    assert out.shape == (B, (H // P) * (W // P), E)
    assert jnp.allclose(out, ref, atol=2e-2, rtol=2e-2)

    print("KERNEL_OK")
</pallas_src>

<mosaic_0001>
module attributes {stable_mosaic.version = 11 : i64} {
  func.func @_patch_embed_kernel(%arg0: i32, %arg1: memref<32x48xf32, #tpu.memory_space<vmem>>, %arg2: memref<48x128xbf16, #tpu.memory_space<vmem>>, %arg3: memref<1x128xf32, #tpu.memory_space<vmem>>, %arg4: memref<32x128xf32, #tpu.memory_space<vmem>>) attributes {dimension_semantics = [#tpu.dimension_semantics<parallel>], iteration_bounds = array<i64: 1>, scalar_prefetch = 0 : i64, scratch_operands = 0 : i64, tpu.core_type = #tpu.core_type<tc>, window_params = [{transform_indices = @transform_0, window_bounds = array<i64: 32, 48>}, {pipeline_mode = #tpu.pipeline_mode<synchronous>, transform_indices = @transform_1, window_bounds = array<i64: 48, 128>}, {pipeline_mode = #tpu.pipeline_mode<synchronous>, transform_indices = @transform_2, window_bounds = array<i64: 1, 128>}, {transform_indices = @transform_3, window_bounds = array<i64: 32, 128>}]} {
    %c0 = arith.constant 0 : index
    %c0_0 = arith.constant 0 : index
    %0 = vector.load %arg1[%c0, %c0_0] : memref<32x48xf32, #tpu.memory_space<vmem>>, vector<32x48xf32>
    %1 = arith.truncf %0 : vector<32x48xf32> to vector<32x48xbf16>
    %c0_1 = arith.constant 0 : index
    %c0_2 = arith.constant 0 : index
    %2 = vector.load %arg2[%c0_1, %c0_2] : memref<48x128xbf16, #tpu.memory_space<vmem>>, vector<48x128xbf16>
    %cst = arith.constant dense<0.000000e+00> : vector<32x128xf32>
    %3 = tpu.matmul %1, %2, %cst {dimension_numbers = #tpu.dot_dimension_numbers<[1], [0], [0], [1], [0, 0, 1, 1], [], []>} : vector<32x48xbf16>, vector<48x128xbf16>, vector<32x128xf32> -> vector<32x128xf32>
    %c0_3 = arith.constant 0 : index
    %c0_4 = arith.constant 0 : index
    %4 = vector.load %arg3[%c0_3, %c0_4] : memref<1x128xf32, #tpu.memory_space<vmem>>, vector<1x128xf32>
    %5 = vector.broadcast %4 : vector<1x128xf32> to vector<32x128xf32>
    %6 = arith.addf %3, %5 : vector<32x128xf32>
    %c0_5 = arith.constant 0 : index
    %c0_6 = arith.constant 0 : index
    %7 = vector.load %arg4[%c0_5, %c0_6] : memref<32x128xf32, #tpu.memory_space<vmem>>, vector<32x128xf32>
    tpu.vector_store %arg4[%c0_5, %c0_6], %6 {strides = array<i32>} : memref<32x128xf32, #tpu.memory_space<vmem>>, vector<32x128xf32>,
    return
  }
  func.func @transform_0(%arg0: i32) -> (i32, i32) {
    %c0_i32 = arith.constant 0 : i32
    %c0_i32_0 = arith.constant 0 : i32
    return %arg0, %c0_i32 : i32, i32
  }
  func.func @transform_1(%arg0: i32) -> (i32, i32) {
    %c0_i32 = arith.constant 0 : i32
    %c0_i32_0 = arith.constant 0 : i32
    %c0_i32_1 = arith.constant 0 : i32
    return %c0_i32, %c0_i32_0 : i32, i32
  }
  func.func @transform_2(%arg0: i32) -> (i32, i32) {
    %c0_i32 = arith.constant 0 : i32
    %c0_i32_0 = arith.constant 0 : i32
    %c0_i32_1 = arith.constant 0 : i32
    return %c0_i32, %c0_i32_0 : i32, i32
  }
  func.func @transform_3(%arg0: i32) -> (i32, i32) {
    %c0_i32 = arith.constant 0 : i32
    %c0_i32_0 = arith.constant 0 : i32
    return %arg0, %c0_i32 : i32, i32
  }
}

</mosaic_0001>

<bundles_post_ra>
// kernel: patch_encoder_forward.1
= control target key start
LH: loop header
LB: loop body
LE: loop exit
PB: predicated region body
PF: predicated region fallthrough
CT: control target
= control target key end

     0   :  { %s198_s0 = inlined_call_operand.vmem [shape: f32[32,48], index: 0, kind: input, shape index: {}]   ;;  %s199_s1 = inlined_call_operand.vmem [shape: bf16[48,128], index: 1, kind: input, shape index: {}]   ;;  %s200_s2 = inlined_call_operand.vmem [shape: f32[1,128], index: 2, kind: input, shape index: {}]   ;;  %s201_s3 = inlined_call_operand.hbm [shape: f32[32,128], index: 3, kind: output, shape index: {}]  }
   0x1   :  { %v114_v0 = vld [vmem:[%s199_s1 + $0x10] sm:$0xff]  ;;  %v113_v1 = vld [vmem:[%s199_s1 + $0x8] sm:$0xff] }
   0x2   :  { %62 = vmatpush.bf16.msra.mxu0 %v114_v0  ;;  %115 = vmatpush.bf16.msra.mxu1 %v114_v0 }
   0x3   :  { %8 = vsyncpa [#allocation3], 0  ;;  %v112_v2 = vld [vmem:[%s199_s1] sm:$0xff]  ;;  %v17_v4 = vld [vmem:[%s198_s0 + $0x8] sm:$0xff]  ;;  %vm50_vm0 = vcmask 392192   ;;  %s148_s27 = smov [#allocation2]  }
   0x4   :  { %v16_v3 = vld [vmem:[%s198_s0] sm:$0xff]  ;;  %v18_v5 = vld [vmem:[%s198_s0 + $0x10] sm:$0xff]  ;;  %v19_v6 = vld [vmem:[%s198_s0 + $0x18] sm:$0xff]  ;;  %s84_s28 = sshll.u32 %s148_s27, 4  ;;  %s86_s30 = sshll.u32 %s201_s3, 4  ;;  %s85_s28 = int_to_ptr.vmem [resolvable:$true] %s84_s28  ;;  %s87_s30 = int_to_ptr.hbm [resolvable:$true] %s86_s30 }
   0x5   :  { %v20_v7 = vpack.c.bf16 %v17_v4, %v16_v3  ;;  %v21_v8 = vpack.c.bf16 %v19_v6, %v18_v5  ;;  %v121_v9 = vld [vmem:[%s200_s2] ss:$0 sm:$0xff]  ;;  %s149_s2 = smov 128   ;;  %s150_s4 = smov 8  }
   0x6   :  { %63 = vmatpush.bf16.msra.mxu0 %v113_v1  ;;  %116 = vmatpush.bf16.msra.mxu1 %v113_v1 }
   0xa   :  { %64 = vmatpush.bf16.msra.mxu0 %v112_v2  ;;  %117 = vmatpush.bf16.msra.mxu1 %v112_v2 }
   0xd   :  { %110 = vmatmul.msk.bf16.vlgmr.msra.gmra.mxu0 %vm50_vm0, %v20_v7  ;;  %111 = vmatmul.msk.bf16.vlgmr.msra.gmra.mxu1 %vm50_vm0, %v21_v8 }
  0x8a   :  { %v66_v10 = vpop.f32.mrf.mxu0  ;;  %v71_v11 = vpop.f32.mrf.mxu1 }
  0x8b   :  { %v67_v12 = vadd.f32 %v121_v9, %v66_v10  ;;  %v72_v13 = vadd.f32 %v121_v9, %v71_v11 }
  0x8d   :  { %76 = vst [vmem:[#allocation2] sm:$0xff] %v67_v12 }
  0x8e   :  { %78 = vst [vmem:[#allocation2 + $0x10] sm:$0xff] %v72_v13 }
  0x92   :  { %v68_v14 = vpop.f32.mrf.mxu0  ;;  %v73_v15 = vpop.f32.mrf.mxu1 }
  0x93   :  { %v69_v16 = vadd.f32 %v121_v9, %v68_v14  ;;  %v74_v17 = vadd.f32 %v121_v9, %v73_v15 }
  0x95   :  { %77 = vst [vmem:[#allocation2 + $0x8] sm:$0xff] %v69_v16 }
  0x96   :  { %79 = vst [vmem:[#allocation2 + $0x18] sm:$0xff] %v74_v17 }
  0x97   :  { %92 = dma.vmem_to_hbm [thread:$0]  %s85_s28, 512, %s87_s30, [#allocation3], %s149_s2, %s149_s2, %s150_s4  }
  0x98   :  { %146 = dma.done.wait [#allocation3], 512  }
  0x99   :  { %147 = vsyncadd [#allocation3], 4294966784 }
  0x9a   :  { %97 = vsyncpa [#allocation3], 1 }

</bundles_post_ra>
